<compile_context>
chip_gen: v6e
topology: v6e:2x2x1
jax: 0.10.0
libtpu: 0.0.40
codegen_flags: <defaults>
</compile_context>

<pallas_src>
import functools

import jax
import jax.numpy as jnp
from jax.experimental import pallas as pl
from jax.experimental.pallas import tpu as pltpu

_HEAD_W = 128  # lane-dense head width: Q values live in lanes 0..n_actions-1


def _dueling_dqn_kernel(x_ref, w1_ref, w2_ref, wh1_ref, wa2_ref, b_ref, out_ref,
                        *, inv_n_actions):
    f32 = jnp.float32
    bf16 = jnp.bfloat16

    b = b_ref[...]                           # (8, 512) f32 packed biases + value-row weight
    b1 = b[0:1, 0:128]                       # trunk layer-1 bias
    b2 = b[1:2, 0:256]                       # trunk layer-2 bias
    bh = b[2:3, 0:512]                       # fused [value | adv] hidden bias
    ba2 = b[3:4, 0:_HEAD_W]                  # adv output bias (padded lanes are 0)
    wv2 = b[4:5, 0:256]                      # value output weight, stored as a row
    bv2 = b[5:6, 0:1]                        # value output bias (scalar)

    # --- trunk: Linear -> ReLU -> Linear -> ReLU (bf16 x bf16 -> f32 dots) ---
    h = jnp.dot(x_ref[...].astype(bf16), w1_ref[...],
                preferred_element_type=f32) + b1
    h = jnp.maximum(h, 0.0)                  # (bb, 128) f32
    h = jnp.dot(h.astype(bf16), w2_ref[...],
                preferred_element_type=f32) + b2
    h = jnp.maximum(h, 0.0)                  # (bb, 256) f32

    # --- fused head hidden layers: hh = [value_hidden | adv_hidden] ----------
    hh = jnp.dot(h.astype(bf16), wh1_ref[...],
                 preferred_element_type=f32) + bh
    hh = jnp.maximum(hh, 0.0)                # (bb, 512) f32

    # --- advantage output: lanes 0..n_actions-1 are real, padded lanes are 0 -
    adv = jnp.dot(hh[:, 256:512].astype(bf16), wa2_ref[...],
                  preferred_element_type=f32) + ba2
    adv = jnp.maximum(adv, 0.0)              # (bb, 128) f32

    # --- value output: VPU multiply + lane reduction (K=256, single output) --
    val = jnp.sum(hh[:, 0:256] * wv2, axis=1, keepdims=True) + bv2
    val = jnp.maximum(val, 0.0)              # (bb, 1) f32

    # --- dueling combine: q = val + adv - mean(adv) over the TRUE n_actions --
    adv_mean = jnp.sum(adv, axis=1, keepdims=True) * inv_n_actions
    out_ref[...] = adv + (val - adv_mean)    # lanes 0..n_actions-1 are Q


def pack_params(p, n_actions):
    """Pack the logical (PyTorch-shaped, [in, out]) params into kernel operands."""
    assert n_actions <= _HEAD_W, "n_actions too large for lane-dense head width"
    bf16 = jnp.bfloat16

    w1 = p["w1"].astype(bf16)                                            # (n_states, 128)
    w2 = p["w2"].astype(bf16)                                            # (128, 256)
    wh1 = jnp.concatenate([p["wv1"], p["wa1"]], axis=1).astype(bf16)     # (256, 512)

    wa2 = jnp.zeros((256, _HEAD_W), jnp.float32)
    wa2 = wa2.at[:, 0:n_actions].set(p["wa2"])
    wa2 = wa2.astype(bf16)                                               # (256, 128)

    b_all = jnp.zeros((8, 512), jnp.float32)                             # full sublane tile
    b_all = b_all.at[0, 0:128].set(p["b1"][0])
    b_all = b_all.at[1, 0:256].set(p["b2"][0])
    b_all = b_all.at[2, 0:256].set(p["bv1"][0])
    b_all = b_all.at[2, 256:512].set(p["ba1"][0])
    b_all = b_all.at[3, 0:n_actions].set(p["ba2"][0])
    b_all = b_all.at[4, 0:256].set(p["wv2"][:, 0])
    b_all = b_all.at[5, 0].set(p["bv2"][0, 0])

    return dict(w1=w1, w2=w2, wh1=wh1, wa2=wa2, b_all=b_all)


def pa_dueling_dqn_forward(x, packed, n_actions):
    """x: (batch, n_states) f32 -> (batch, n_actions) f32."""
    batch, n_states = x.shape

    def rup(n, m):
        return ((n + m - 1) // m) * m

    if batch <= 512:
        bb = rup(batch, 8)                     # single block, minimal padding
    else:
        # Big batches: large blocks (multiple of 256 for the 256x256 MXU) while
        # keeping >= 2 grid steps so v7x can shard the batch over both TCs.
        bb = min(1024, rup(pl.cdiv(batch, 2), 256))
    batch_pad = rup(batch, bb)
    if batch_pad != batch:
        x = jnp.pad(x, ((0, batch_pad - batch), (0, 0)))
    grid = (batch_pad // bb,)

    kernel = functools.partial(_dueling_dqn_kernel, inv_n_actions=1.0 / n_actions)

    out = pl.pallas_call(
        kernel,
        out_shape=jax.ShapeDtypeStruct((batch_pad, _HEAD_W), jnp.float32),
        grid=grid,
        in_specs=[
            pl.BlockSpec((bb, n_states), lambda i: (i, 0)),          # x (per block)
            pl.BlockSpec(packed["w1"].shape, lambda i: (0, 0)),      # resident weights
            pl.BlockSpec(packed["w2"].shape, lambda i: (0, 0)),
            pl.BlockSpec(packed["wh1"].shape, lambda i: (0, 0)),
            pl.BlockSpec(packed["wa2"].shape, lambda i: (0, 0)),
            pl.BlockSpec(packed["b_all"].shape, lambda i: (0, 0)),
        ],
        out_specs=pl.BlockSpec((bb, _HEAD_W), lambda i: (i, 0)),
        compiler_params=pltpu.CompilerParams(dimension_semantics=("parallel",)),
    )(x, packed["w1"], packed["w2"], packed["wh1"], packed["wa2"], packed["b_all"])

    # Leading contiguous slice: lanes 0..n_actions-1 of the lane-dense slab.
    return out[:batch, :n_actions]


def init_params(key, n_states, n_actions):
    """Synthetic nn.Linear-style init, weights stored [in, out].

    Weights are round-tripped through bf16 so the bf16-packed kernel weights
    and the f32 reference use bit-identical weight values."""
    ks = jax.random.split(key, 12)

    def lin(kw, kb, fan_in, fan_out):
        scale = 1.0 / jnp.sqrt(fan_in)
        w = jax.random.uniform(kw, (fan_in, fan_out), jnp.float32, -scale, scale)
        w = w.astype(jnp.bfloat16).astype(jnp.float32)
        b = jax.random.uniform(kb, (1, fan_out), jnp.float32, -scale, scale)
        return w, b

    w1, b1 = lin(ks[0], ks[1], n_states, 128)
    w2, b2 = lin(ks[2], ks[3], 128, 256)
    wv1, bv1 = lin(ks[4], ks[5], 256, 256)
    wv2, bv2 = lin(ks[6], ks[7], 256, 1)
    wa1, ba1 = lin(ks[8], ks[9], 256, 256)
    wa2, ba2 = lin(ks[10], ks[11], 256, n_actions)

    return dict(w1=w1, b1=b1, w2=w2, b2=b2,
                wv1=wv1, bv1=bv1, wv2=wv2, bv2=bv2,
                wa1=wa1, ba1=ba1, wa2=wa2, ba2=ba2)


def reference_forward_f32(x, p):
    """Pure-JAX f32 reference of the PyTorch forward (trailing head ReLUs kept)."""
    hi = jax.lax.Precision.HIGHEST
    h = jax.nn.relu(jnp.dot(x, p["w1"], precision=hi) + p["b1"])
    h = jax.nn.relu(jnp.dot(h, p["w2"], precision=hi) + p["b2"])
    v = jax.nn.relu(jnp.dot(jax.nn.relu(jnp.dot(h, p["wv1"], precision=hi) + p["bv1"]),
                            p["wv2"], precision=hi) + p["bv2"])
    a = jax.nn.relu(jnp.dot(jax.nn.relu(jnp.dot(h, p["wa1"], precision=hi) + p["ba1"]),
                            p["wa2"], precision=hi) + p["ba2"])
    return v + a - a.mean(axis=1, keepdims=True)


def reference_forward_bf16(x, p):
    """Reference mimicking the kernel's bf16-activation dot path."""
    bf16, f32 = jnp.bfloat16, jnp.float32

    def bdot(a, w):
        return jnp.dot(a.astype(bf16), w.astype(bf16), preferred_element_type=f32)

    h = jax.nn.relu(bdot(x, p["w1"]) + p["b1"])
    h = jax.nn.relu(bdot(h, p["w2"]) + p["b2"])
    hv = jax.nn.relu(bdot(h, p["wv1"]) + p["bv1"])
    ha = jax.nn.relu(bdot(h, p["wa1"]) + p["ba1"])
    v = jax.nn.relu(jnp.sum(hv * p["wv2"].T, axis=1, keepdims=True) + p["bv2"])
    a = jax.nn.relu(bdot(ha, p["wa2"]) + p["ba2"])
    return v + a - a.mean(axis=1, keepdims=True)


if __name__ == "__main__":
    key = jax.random.PRNGKey(0)
    k_params, k_x = jax.random.split(key)

    batch = 8
    n_states = 16
    n_actions = 8

    params = init_params(k_params, n_states, n_actions)
    packed = pack_params(params, n_actions)
    x = jax.random.normal(k_x, (batch, n_states), dtype=jnp.float32)

    out = pa_dueling_dqn_forward(x, packed, n_actions)
    out = jax.block_until_ready(out)
    assert out.shape == (batch, n_actions)

    # Tight check vs. a reference using the same bf16-activation dot path.
    ref_bf16 = reference_forward_bf16(x, params)
    assert jnp.allclose(out, ref_bf16, atol=1e-3, rtol=1e-3), "mismatch vs bf16 reference"

    # Looser check vs. the exact-f32 PyTorch-equivalent reference (bf16 drift).
    ref_f32 = reference_forward_f32(x, params)
    assert jnp.allclose(out, ref_f32, atol=5e-2, rtol=5e-2), "mismatch vs f32 reference"

    print("KERNEL_OK")
</pallas_src>

<mosaic_0001>
module attributes {stable_mosaic.version = 11 : i64} {
  func.func @_dueling_dqn_kernel(%arg0: i32, %arg1: memref<8x16xf32, #tpu.memory_space<vmem>>, %arg2: memref<16x128xbf16, #tpu.memory_space<vmem>>, %arg3: memref<128x256xbf16, #tpu.memory_space<vmem>>, %arg4: memref<256x512xbf16, #tpu.memory_space<vmem>>, %arg5: memref<256x128xbf16, #tpu.memory_space<vmem>>, %arg6: memref<8x512xf32, #tpu.memory_space<vmem>>, %arg7: memref<8x128xf32, #tpu.memory_space<vmem>>) attributes {dimension_semantics = [#tpu.dimension_semantics<parallel>], iteration_bounds = array<i64: 1>, scalar_prefetch = 0 : i64, scratch_operands = 0 : i64, tpu.core_type = #tpu.core_type<tc>, window_params = [{transform_indices = @transform_0, window_bounds = array<i64: 8, 16>}, {pipeline_mode = #tpu.pipeline_mode<synchronous>, transform_indices = @transform_1, window_bounds = array<i64: 16, 128>}, {pipeline_mode = #tpu.pipeline_mode<synchronous>, transform_indices = @transform_2, window_bounds = array<i64: 128, 256>}, {pipeline_mode = #tpu.pipeline_mode<synchronous>, transform_indices = @transform_3, window_bounds = array<i64: 256, 512>}, {pipeline_mode = #tpu.pipeline_mode<synchronous>, transform_indices = @transform_4, window_bounds = array<i64: 256, 128>}, {pipeline_mode = #tpu.pipeline_mode<synchronous>, transform_indices = @transform_5, window_bounds = array<i64: 8, 512>}, {transform_indices = @transform_6, window_bounds = array<i64: 8, 128>}]} {
    %c0 = arith.constant 0 : index
    %c0_0 = arith.constant 0 : index
    %0 = vector.load %arg6[%c0, %c0_0] : memref<8x512xf32, #tpu.memory_space<vmem>>, vector<8x512xf32>
    %1 = vector.extract_strided_slice %0 {offsets = [0, 0], sizes = [1, 128], strides = [1, 1]} : vector<8x512xf32> to vector<1x128xf32>
    %2 = vector.extract_strided_slice %0 {offsets = [1, 0], sizes = [1, 256], strides = [1, 1]} : vector<8x512xf32> to vector<1x256xf32>
    %3 = vector.extract_strided_slice %0 {offsets = [2, 0], sizes = [1, 512], strides = [1, 1]} : vector<8x512xf32> to vector<1x512xf32>
    %4 = vector.extract_strided_slice %0 {offsets = [3, 0], sizes = [1, 128], strides = [1, 1]} : vector<8x512xf32> to vector<1x128xf32>
    %5 = vector.extract_strided_slice %0 {offsets = [4, 0], sizes = [1, 256], strides = [1, 1]} : vector<8x512xf32> to vector<1x256xf32>
    %6 = vector.extract_strided_slice %0 {offsets = [5, 0], sizes = [1, 1], strides = [1, 1]} : vector<8x512xf32> to vector<1x1xf32>
    %c0_1 = arith.constant 0 : index
    %c0_2 = arith.constant 0 : index
    %7 = vector.load %arg1[%c0_1, %c0_2] : memref<8x16xf32, #tpu.memory_space<vmem>>, vector<8x16xf32>
    %8 = arith.truncf %7 : vector<8x16xf32> to vector<8x16xbf16>
    %c0_3 = arith.constant 0 : index
    %c0_4 = arith.constant 0 : index
    %9 = vector.load %arg2[%c0_3, %c0_4] : memref<16x128xbf16, #tpu.memory_space<vmem>>, vector<16x128xbf16>
    %cst = arith.constant dense<0.000000e+00> : vector<8x128xf32>
    %10 = tpu.matmul %8, %9, %cst {dimension_numbers = #tpu.dot_dimension_numbers<[1], [0], [0], [1], [0, 0, 1, 1], [], []>} : vector<8x16xbf16>, vector<16x128xbf16>, vector<8x128xf32> -> vector<8x128xf32>
    %11 = vector.broadcast %1 : vector<1x128xf32> to vector<8x128xf32>
    %12 = arith.addf %10, %11 : vector<8x128xf32>
    %cst_5 = arith.constant 0.000000e+00 : f32
    %13 = vector.broadcast %cst_5 : f32 to vector<8x128xf32>
    %14 = arith.maximumf %12, %13 : vector<8x128xf32>
    %15 = arith.truncf %14 : vector<8x128xf32> to vector<8x128xbf16>
    %c0_6 = arith.constant 0 : index
    %c0_7 = arith.constant 0 : index
    %16 = vector.load %arg3[%c0_6, %c0_7] : memref<128x256xbf16, #tpu.memory_space<vmem>>, vector<128x256xbf16>
    %cst_8 = arith.constant dense<0.000000e+00> : vector<8x256xf32>
    %17 = tpu.matmul %15, %16, %cst_8 {dimension_numbers = #tpu.dot_dimension_numbers<[1], [0], [0], [1], [0, 0, 1, 1], [], []>} : vector<8x128xbf16>, vector<128x256xbf16>, vector<8x256xf32> -> vector<8x256xf32>
    %18 = vector.broadcast %2 : vector<1x256xf32> to vector<8x256xf32>
    %19 = arith.addf %17, %18 : vector<8x256xf32>
    %cst_9 = arith.constant 0.000000e+00 : f32
    %20 = vector.broadcast %cst_9 : f32 to vector<8x256xf32>
    %21 = arith.maximumf %19, %20 : vector<8x256xf32>
    %22 = arith.truncf %21 : vector<8x256xf32> to vector<8x256xbf16>
    %c0_10 = arith.constant 0 : index
    %c0_11 = arith.constant 0 : index
    %23 = vector.load %arg4[%c0_10, %c0_11] : memref<256x512xbf16, #tpu.memory_space<vmem>>, vector<256x512xbf16>
    %cst_12 = arith.constant dense<0.000000e+00> : vector<8x512xf32>
    %24 = tpu.matmul %22, %23, %cst_12 {dimension_numbers = #tpu.dot_dimension_numbers<[1], [0], [0], [1], [0, 0, 1, 1], [], []>} : vector<8x256xbf16>, vector<256x512xbf16>, vector<8x512xf32> -> vector<8x512xf32>
    %25 = vector.broadcast %3 : vector<1x512xf32> to vector<8x512xf32>
    %26 = arith.addf %24, %25 : vector<8x512xf32>
    %cst_13 = arith.constant 0.000000e+00 : f32
    %27 = vector.broadcast %cst_13 : f32 to vector<8x512xf32>
    %28 = arith.maximumf %26, %27 : vector<8x512xf32>
    %29 = vector.extract_strided_slice %28 {offsets = [0, 256], sizes = [8, 256], strides = [1, 1]} : vector<8x512xf32> to vector<8x256xf32>
    %30 = arith.truncf %29 : vector<8x256xf32> to vector<8x256xbf16>
    %c0_14 = arith.constant 0 : index
    %c0_15 = arith.constant 0 : index
    %31 = vector.load %arg5[%c0_14, %c0_15] : memref<256x128xbf16, #tpu.memory_space<vmem>>, vector<256x128xbf16>
    %cst_16 = arith.constant dense<0.000000e+00> : vector<8x128xf32>
    %32 = tpu.matmul %30, %31, %cst_16 {dimension_numbers = #tpu.dot_dimension_numbers<[1], [0], [0], [1], [0, 0, 1, 1], [], []>} : vector<8x256xbf16>, vector<256x128xbf16>, vector<8x128xf32> -> vector<8x128xf32>
    %33 = vector.broadcast %4 : vector<1x128xf32> to vector<8x128xf32>
    %34 = arith.addf %32, %33 : vector<8x128xf32>
    %cst_17 = arith.constant 0.000000e+00 : f32
    %35 = vector.broadcast %cst_17 : f32 to vector<8x128xf32>
    %36 = arith.maximumf %34, %35 : vector<8x128xf32>
    %37 = vector.extract_strided_slice %28 {offsets = [0, 0], sizes = [8, 256], strides = [1, 1]} : vector<8x512xf32> to vector<8x256xf32>
    %38 = vector.broadcast %5 : vector<1x256xf32> to vector<8x256xf32>
    %39 = arith.mulf %37, %38 : vector<8x256xf32>
    %cst_18 = arith.constant dense<0.000000e+00> : vector<8xf32>
    %40 = vector.multi_reduction <add>, %39, %cst_18 [1] : vector<8x256xf32> to vector<8xf32>
    %41 = vector.shape_cast %40 : vector<8xf32> to vector<8x1xf32>
    %42 = vector.broadcast %6 : vector<1x1xf32> to vector<8x1xf32>
    %43 = arith.addf %41, %42 : vector<8x1xf32>
    %cst_19 = arith.constant 0.000000e+00 : f32
    %44 = vector.broadcast %cst_19 : f32 to vector<8x1xf32>
    %45 = arith.maximumf %43, %44 : vector<8x1xf32>
    %cst_20 = arith.constant dense<0.000000e+00> : vector<8xf32>
    %46 = vector.multi_reduction <add>, %36, %cst_20 [1] : vector<8x128xf32> to vector<8xf32>
    %47 = vector.shape_cast %46 : vector<8xf32> to vector<8x1xf32>
    %cst_21 = arith.constant 1.250000e-01 : f32
    %48 = vector.broadcast %cst_21 : f32 to vector<8x1xf32>
    %49 = arith.mulf %47, %48 : vector<8x1xf32>
    %50 = arith.subf %45, %49 : vector<8x1xf32>
    %51 = vector.broadcast %50 : vector<8x1xf32> to vector<8x128xf32>
    %52 = arith.addf %36, %51 : vector<8x128xf32>
    %c0_22 = arith.constant 0 : index
    %c0_23 = arith.constant 0 : index
    %53 = vector.load %arg7[%c0_22, %c0_23] : memref<8x128xf32, #tpu.memory_space<vmem>>, vector<8x128xf32>
    tpu.vector_store %arg7[%c0_22, %c0_23], %52 {strides = array<i32>} : memref<8x128xf32, #tpu.memory_space<vmem>>, vector<8x128xf32>,
    return
  }
  func.func @transform_0(%arg0: i32) -> (i32, i32) {
    %c0_i32 = arith.constant 0 : i32
    %c0_i32_0 = arith.constant 0 : i32
    return %arg0, %c0_i32 : i32, i32
  }
  func.func @transform_1(%arg0: i32) -> (i32, i32) {
    %c0_i32 = arith.constant 0 : i32
    %c0_i32_0 = arith.constant 0 : i32
    %c0_i32_1 = arith.constant 0 : i32
    return %c0_i32, %c0_i32_0 : i32, i32
  }
  func.func @transform_2(%arg0: i32) -> (i32, i32) {
    %c0_i32 = arith.constant 0 : i32
    %c0_i32_0 = arith.constant 0 : i32
    %c0_i32_1 = arith.constant 0 : i32
    return %c0_i32, %c0_i32_0 : i32, i32
  }
  func.func @transform_3(%arg0: i32) -> (i32, i32) {
    %c0_i32 = arith.constant 0 : i32
    %c0_i32_0 = arith.constant 0 : i32
    %c0_i32_1 = arith.constant 0 : i32
    return %c0_i32, %c0_i32_0 : i32, i32
  }
  func.func @transform_4(%arg0: i32) -> (i32, i32) {
    %c0_i32 = arith.constant 0 : i32
    %c0_i32_0 = arith.constant 0 : i32
    %c0_i32_1 = arith.constant 0 : i32
    return %c0_i32, %c0_i32_0 : i32, i32
  }
  func.func @transform_5(%arg0: i32) -> (i32, i32) {
    %c0_i32 = arith.constant 0 : i32
    %c0_i32_0 = arith.constant 0 : i32
    %c0_i32_1 = arith.constant 0 : i32
    return %c0_i32, %c0_i32_0 : i32, i32
  }
  func.func @transform_6(%arg0: i32) -> (i32, i32) {
    %c0_i32 = arith.constant 0 : i32
    %c0_i32_0 = arith.constant 0 : i32
    return %arg0, %c0_i32 : i32, i32
  }
}

</mosaic_0001>

<bundles_post_ra>
// kernel: tpu_custom_call.1
= control target key start
LH: loop header
LB: loop body
LE: loop exit
PB: predicated region body
PF: predicated region fallthrough
CT: control target
= control target key end

     0   :  { %11 = vsyncpa [#allocation3], 0  ;;  %s1557_s0 = inlined_call_operand.hbm [shape: f32[8,16], index: 0, kind: input, shape index: {}]   ;;  %s1558_s1 = inlined_call_operand.hbm [shape: bf16[16,128], index: 1, kind: input, shape index: {}]   ;;  %s1559_s2 = inlined_call_operand.hbm [shape: bf16[128,256], index: 2, kind: input, shape index: {}]   ;;  %s1560_s3 = inlined_call_operand.hbm [shape: bf16[256,512], index: 3, kind: input, shape index: {}]   ;;  %s1561_s4 = inlined_call_operand.hbm [shape: bf16[256,128], index: 4, kind: input, shape index: {}]   ;;  %s1562_s5 = inlined_call_operand.hbm [shape: f32[8,512], index: 5, kind: input, shape index: {}]   ;;  %s1563_s6 = inlined_call_operand.hbm [shape: f32[8,128], index: 6, kind: output, shape index: {}]  }
   0x1   :  { %12 = vsyncpa [#allocation6], 0 }
   0x2   :  { %13 = vsyncpa [#allocation9], 0 }
   0x3   :  { %14 = vsyncpa [#allocation12], 0 }
   0x4   :  { %15 = vsyncpa [#allocation4], 0  ;;  %s1458_s21 = smov [#allocation5]  }
   0x5   :  { %s31_s22 = sshll.u32 %s1458_s21, 4  ;;  %s32_s22 = int_to_ptr.vmem [resolvable:$true] %s31_s22 }
   0x6   :  { %s1316_s23 = scalar_lea.vmem %s32_s22, 128  ;;  %p1321_p1 = scmp.lt.s32.totalorder %s32_s22, %s32_s22 }
   0x7   :  { %p1317_p0 = scmp.ne.s32.totalorder %s32_s22, %s1316_s23  ;;  %p1322_p2 = scmp.lt.s32.totalorder %s1316_s23, %s1316_s23 }
   0x9   :  { %p1323_p3 = por %p1322_p2, %p1321_p1 }
   0xb   :  { %p1324_p4 = pnand %p1323_p3, %p1317_p0 }
   0xd   :  { %1327 = shalt.err (!%p1324_p4)
}
   0xe   :  { %s1459_s24 = smov 64   ;;  %s1460_s25 = smov 4  }
   0xf   :  { %37 = dma.hbm_to_vmem [thread:$0]  %s1558_s1, 128, %s32_s22, [#allocation6], %s1459_s24, %s1459_s24, %s1460_s25  }
  0x10   :  { %s1461_s28 = smov [#allocation8]  }
  0x11   :  { %s55_s29 = sshll.u32 %s1461_s28, 4  ;;  %s56_s29 = int_to_ptr.vmem [resolvable:$true] %s55_s29 }
  0x12   :  { %s1336_s30 = scalar_lea.vmem %s56_s29, 8192  ;;  %p1341_p6 = scmp.lt.s32.totalorder %s56_s29, %s56_s29 }
  0x13   :  { %p1337_p5 = scmp.ne.s32.totalorder %s56_s29, %s1336_s30  ;;  %p1342_p7 = scmp.lt.s32.totalorder %s1336_s30, %s1336_s30 }
  0x15   :  { %p1343_p8 = por %p1342_p7, %p1341_p6 }
  0x17   :  { %p1344_p9 = pnand %p1343_p8, %p1337_p5 }
  0x19   :  { %1347 = shalt.err (!%p1344_p9)
}
  0x1a   :  { %s1462_s7 = smov 256   ;;  %s1463_s8 = smov 16  }
  0x1b   :  { %61 = dma.hbm_to_vmem [thread:$0]  %s1560_s3, 8192, %s56_s29, [#allocation9], %s1462_s7, %s1462_s7, %s1463_s8  }
  0x1c   :  { %s1464_s11 = smov [#allocation2]   ;;  %s1465_s13 = smov [#allocation7]  }
  0x1d   :  { %s22_s12 = sshll.u32 %s1464_s11, 4  ;;  %s43_s1 = sshll.u32 %s1465_s13, 4  ;;  %s23_s12 = int_to_ptr.vmem [resolvable:$true] %s22_s12  ;;  %s44_s1 = int_to_ptr.vmem [resolvable:$true] %s43_s1 }
  0x1e   :  { %s1356_s14 = scalar_lea.vmem %s23_s12, 128  ;;  %p1361_p11 = scmp.lt.s32.totalorder %s23_s12, %s23_s12 }
  0x1f   :  { %p1357_p10 = scmp.ne.s32.totalorder %s23_s12, %s1356_s14  ;;  %p1362_p12 = scmp.lt.s32.totalorder %s1356_s14, %s1356_s14 }
  0x21   :  { %p1363_p13 = por %p1362_p12, %p1361_p11 }
  0x23   :  { %p1364_p0 = pnand %p1363_p13, %p1357_p10 }
  0x25   :  { %1367 = shalt.err (!%p1364_p0)
}
  0x26   :  { %25 = dma.hbm_to_vmem [thread:$0]  %s1557_s0, 128, %s23_s12, [#allocation3]  }
  0x27   :  { %s1376_s17 = scalar_lea.vmem %s44_s1, 2048  ;;  %p1381_p2 = scmp.lt.s32.totalorder %s44_s1, %s44_s1 }
  0x28   :  { %p1377_p1 = scmp.ne.s32.totalorder %s44_s1, %s1376_s17  ;;  %p1382_p3 = scmp.lt.s32.totalorder %s1376_s17, %s1376_s17 }
  0x2a   :  { %p1383_p4 = por %p1382_p3, %p1381_p2 }
  0x2c   :  { %p1384_p5 = pnand %p1383_p4, %p1377_p1 }
  0x2e   :  { %1387 = shalt.err (!%p1384_p5)
}
  0x2f   :  { %s1466_s3 = smov 128   ;;  %s1467_s18 = smov 8  }
  0x30   :  { %49 = dma.hbm_to_vmem [thread:$0]  %s1559_s2, 2048, %s44_s1, [#allocation6], %s1466_s3, %s1466_s3, %s1467_s18  }
  0x31   :  { %s1468_s21 = smov [#allocation10]   ;;  %s1469_s23 = smov [#allocation11]  }
  0x32   :  { %s67_s22 = sshll.u32 %s1468_s21, 4  ;;  %s80_s26 = sshll.u32 %s1469_s23, 4  ;;  %s68_s22 = int_to_ptr.vmem [resolvable:$true] %s67_s22  ;;  %s81_s26 = int_to_ptr.vmem [resolvable:$true] %s80_s26 }
  0x33   :  { %s1396_s0 = scalar_lea.vmem %s68_s22, 2048  ;;  %p1401_p7 = scmp.lt.s32.totalorder %s68_s22, %s68_s22 }
  0x34   :  { %p1397_p6 = scmp.ne.s32.totalorder %s68_s22, %s1396_s0  ;;  %p1402_p8 = scmp.lt.s32.totalorder %s1396_s0, %s1396_s0 }
  0x36   :  { %p1403_p9 = por %p1402_p8, %p1401_p7 }
  0x38   :  { %p1404_p10 = pnand %p1403_p9, %p1397_p6 }
  0x3a   :  { %1407 = shalt.err (!%p1404_p10)
}
  0x3b   :  { %73 = dma.hbm_to_vmem [thread:$0]  %s1561_s4, 2048, %s68_s22, [#allocation9], %s1459_s24, %s1459_s24, %s1460_s25  }
  0x3c   :  { %s1416_s2 = scalar_lea.vmem %s81_s26, 512  ;;  %p1421_p12 = scmp.lt.s32.totalorder %s81_s26, %s81_s26 }
  0x3d   :  { %p1417_p11 = scmp.ne.s32.totalorder %s81_s26, %s1416_s2  ;;  %p1422_p13 = scmp.lt.s32.totalorder %s1416_s2, %s1416_s2 }
  0x3f   :  { %p1423_p0 = por %p1422_p13, %p1421_p12 }
  0x41   :  { %p1424_p1 = pnand %p1423_p0, %p1417_p11 }
  0x43   :  { %1427 = shalt.err (!%p1424_p1)
}
  0x44   :  { %83 = dma.hbm_to_vmem [thread:$0]  %s1562_s5, 512, %s81_s26, [#allocation12]  }
  0x45   :  { %1448 = dma.done.wait [#allocation3], 128  }
  0x46   :  { %1449 = vsyncadd [#allocation3], 4294967168 }
  0x47   :  { %1450 = dma.done.wait [#allocation6], 2176  }
  0x48   :  { %1451 = vsyncadd [#allocation6], 4294965120 }
  0x49   :  { %1452 = dma.done.wait [#allocation9], 10240  }
  0x4a   :  { %1453 = vsyncadd [#allocation9], 4294957056 }
  0x4b   :  { %1454 = dma.done.wait [#allocation12], 512  }
  0x4c   :  { %1455 = vsyncadd [#allocation12], 4294966784  ;;  %v1470_v0 = vmov 0.0   ;;  %vm1471_vm0 = vmmov 0   ;;  %v1171_v1 = vld [vmem:[#allocation5] sm:$0xff]   ;;  %v107_v2 = vld [vmem:[#allocation2] sm:$0xff]  ;;  %v111_v50 = vlaneseq }
  0x4d   :  { %1147 = vmatprep.subr.bf16.mxu0 %v1470_v0  ;;  %1149 = vmatprep.mubr.msk.bf16.mxu0 %vm1471_vm0, %v1470_v0  ;;  %v108_v3 = vpack.c.bf16 %v107_v2, %v107_v2  ;;  %vm121_vm1 = vcmask 130048   ;;  %v1172_v4 = vld [vmem:[#allocation7 + $0x74] ss:$8 sps:$4 sm:$0xff]   ;;  %v1174_v5 = vld [vmem:[#allocation7 + $0x70] ss:$8 sps:$4 sm:$0xff]   ;;  %v1472_v20 = vmov 0  }
  0x4e   :  { %1148 = vmatpush3.bf16.msra.mxu0 %v1171_v1  ;;  %v1175_v6 = vld [vmem:[#allocation7 + $0x64] ss:$8 sps:$4 sm:$0xff]   ;;  %271 = vmatprep.subr.bf16.mxu1 %v1172_v4  ;;  %v1177_v7 = vld [vmem:[#allocation7 + $0x60] ss:$8 sps:$4 sm:$0xff]   ;;  %v1178_v8 = vld [vmem:[#allocation7 + $0x54] ss:$8 sps:$4 sm:$0xff]  }
  0x4f   :  { %272 = vmatpush1.bf16.msra.mxu1 %v1174_v5  ;;  %v1180_v9 = vld [vmem:[#allocation7 + $0x50] ss:$8 sps:$4 sm:$0xff]   ;;  %v1181_v10 = vld [vmem:[#allocation7 + $0x44] ss:$8 sps:$4 sm:$0xff]   ;;  %v1183_v11 = vld [vmem:[#allocation7 + $0x40] ss:$8 sps:$4 sm:$0xff]   ;;  %303 = vmatprep.mubr.bf16.mxu1 %v1472_v20 }
  0x50   :  { %273 = vmatprep.subr.bf16.mxu1 %v1175_v6  ;;  %v1184_v12 = vld [vmem:[#allocation7 + $0x34] ss:$8 sps:$4 sm:$0xff]   ;;  %v1186_v13 = vld [vmem:[#allocation7 + $0x30] ss:$8 sps:$4 sm:$0xff]   ;;  %v1187_v14 = vld [vmem:[#allocation7 + $0x24] ss:$8 sps:$4 sm:$0xff]   ;;  %1169 = vset.pattern.permute.xlu1 %v1472_v20 }
  0x51   :  { %1150 = vmatmul.mubr.msk.bf16.vlgmr.msra.gmra.mxu0 %vm121_vm1, %v108_v3  ;;  %v1189_v15 = vld [vmem:[#allocation7 + $0x20] ss:$8 sps:$4 sm:$0xff]   ;;  %v1190_v16 = vld [vmem:[#allocation7 + $0x14] ss:$8 sps:$4 sm:$0xff]   ;;  %v1192_v17 = vld [vmem:[#allocation7 + $0x10] ss:$8 sps:$4 sm:$0xff]   ;;  %1170 = vset.pattern.permute.xlu0 %v1472_v20 }
  0x52   :  { %v1193_v18 = vld [vmem:[#allocation7 + $0x4] ss:$8 sps:$4 sm:$0xff]   ;;  %v1195_v19 = vld [vmem:[#allocation7] ss:$8 sps:$4 sm:$0xff]   ;;  %v1533_v51 = vshrl.u32 %v111_v50, 7  ;;  %v1295_v50 = vld [vmem:[#allocation10 + $0x30] sm:$0xff]  }
  0x53   :  { %274 = vmatpush1.bf16.msra.mxu1 %v1177_v7  ;;  %v1196_v21 = vld [vmem:[#allocation8 + $0xe0] ss:$16 sps:$4 sm:$0xff]   ;;  %v1198_v22 = vld [vmem:[#allocation8 + $0xe4] ss:$16 sps:$4 sm:$0xff]   ;;  %v1201_v23 = vld [vmem:[#allocation8 + $0xec] ss:$16 sps:$4 sm:$0xff]  }
  0x54   :  { %275 = vmatprep.subr.bf16.mxu1 %v1178_v8  ;;  %v1204_v24 = vld [vmem:[#allocation8 + $0xc4] ss:$16 sps:$4 sm:$0xff]   ;;  %716 = vmatprep.subr.bf16.mxu0 %v1198_v22  ;;  %v1202_v25 = vld [vmem:[#allocation8 + $0xc0] ss:$16 sps:$4 sm:$0xff]   ;;  %v113_v52 = vsub.s32 0, %v1533_v51  ;;  %s1473_s4 = smov [#allocation13]  }
  0x55   :  { %717 = vmatpush1.bf16.msra.mxu0 %v1196_v21  ;;  %v1210_v26 = vld [vmem:[#allocation8 + $0xa4] ss:$16 sps:$4 sm:$0xff]   ;;  %v1208_v27 = vld [vmem:[#allocation8 + $0xa0] ss:$16 sps:$4 sm:$0xff]   ;;  %v1199_v60 = vld [vmem:[#allocation8 + $0xe8] ss:$16 sps:$4 sm:$0xff]  }
  0x56   :  { %718 = vmatprep.subr.bf16.mxu0 %v1204_v24  ;;  %v1216_v28 = vld [vmem:[#allocation8 + $0x84] ss:$16 sps:$4 sm:$0xff]   ;;  %v1214_v29 = vld [vmem:[#allocation8 + $0x80] ss:$16 sps:$4 sm:$0xff]   ;;  %v1207_v62 = vld [vmem:[#allocation8 + $0xcc] ss:$16 sps:$4 sm:$0xff]  }
  0x57   :  { %276 = vmatpush1.bf16.msra.mxu1 %v1180_v9  ;;  %v1222_v30 = vld [vmem:[#allocation8 + $0x64] ss:$16 sps:$4 sm:$0xff]   ;;  %v1220_v31 = vld [vmem:[#allocation8 + $0x60] ss:$16 sps:$4 sm:$0xff]   ;;  %v1205_v0 = vld [vmem:[#allocation8 + $0xc8] ss:$16 sps:$4 sm:$0xff]  }
  0x58   :  { %277 = vmatprep.subr.bf16.mxu1 %v1181_v10  ;;  %v1228_v32 = vld [vmem:[#allocation8 + $0x44] ss:$16 sps:$4 sm:$0xff]   ;;  %v1226_v33 = vld [vmem:[#allocation8 + $0x40] ss:$16 sps:$4 sm:$0xff]   ;;  %v1213_v1 = vld [vmem:[#allocation8 + $0xac] ss:$16 sps:$4 sm:$0xff]  }
  0x59   :  { %719 = vmatpush1.bf16.msra.mxu0 %v1202_v25  ;;  %v1234_v34 = vld [vmem:[#allocation8 + $0x24] ss:$16 sps:$4 sm:$0xff]   ;;  %v1232_v35 = vld [vmem:[#allocation8 + $0x20] ss:$16 sps:$4 sm:$0xff]   ;;  %v1211_v2 = vld [vmem:[#allocation8 + $0xa8] ss:$16 sps:$4 sm:$0xff]  }
  0x5a   :  { %720 = vmatprep.subr.bf16.mxu0 %v1210_v26  ;;  %v1240_v36 = vld [vmem:[#allocation8 + $0x4] ss:$16 sps:$4 sm:$0xff]   ;;  %v1238_v37 = vld [vmem:[#allocation8] ss:$16 sps:$4 sm:$0xff]   ;;  %v1219_v3 = vld [vmem:[#allocation8 + $0x8c] ss:$16 sps:$4 sm:$0xff]  }
  0x5b   :  { %278 = vmatpush1.bf16.msra.mxu1 %v1183_v11  ;;  %v1246_v38 = vld [vmem:[#allocation8 + $0x1e4] ss:$16 sps:$4 sm:$0xff]   ;;  %v1244_v39 = vld [vmem:[#allocation8 + $0x1e0] ss:$16 sps:$4 sm:$0xff]   ;;  %v1217_v4 = vld [vmem:[#allocation8 + $0x88] ss:$16 sps:$4 sm:$0xff]  }
  0x5c   :  { %279 = vmatprep.subr.bf16.mxu1 %v1184_v12  ;;  %v1252_v40 = vld [vmem:[#allocation8 + $0x1c4] ss:$16 sps:$4 sm:$0xff]   ;;  %v1250_v41 = vld [vmem:[#allocation8 + $0x1c0] ss:$16 sps:$4 sm:$0xff]   ;;  %v1225_v5 = vld [vmem:[#allocation8 + $0x6c] ss:$16 sps:$4 sm:$0xff]  }
  0x5d   :  { %721 = vmatpush1.bf16.msra.mxu0 %v1208_v27  ;;  %v1258_v42 = vld [vmem:[#allocation8 + $0x1a4] ss:$16 sps:$4 sm:$0xff]   ;;  %v1256_v43 = vld [vmem:[#allocation8 + $0x1a0] ss:$16 sps:$4 sm:$0xff]   ;;  %v1223_v6 = vld [vmem:[#allocation8 + $0x68] ss:$16 sps:$4 sm:$0xff]  }
  0x5e   :  { %722 = vmatprep.subr.bf16.mxu0 %v1216_v28  ;;  %v1264_v44 = vld [vmem:[#allocation8 + $0x184] ss:$16 sps:$4 sm:$0xff]   ;;  %v1262_v45 = vld [vmem:[#allocation8 + $0x180] ss:$16 sps:$4 sm:$0xff]   ;;  %v1231_v7 = vld [vmem:[#allocation8 + $0x4c] ss:$16 sps:$4 sm:$0xff]  }
  0x5f   :  { %280 = vmatpush1.bf16.msra.mxu1 %v1186_v13  ;;  %v1270_v46 = vld [vmem:[#allocation8 + $0x164] ss:$16 sps:$4 sm:$0xff]   ;;  %v1268_v47 = vld [vmem:[#allocation8 + $0x160] ss:$16 sps:$4 sm:$0xff]   ;;  %v1229_v8 = vld [vmem:[#allocation8 + $0x48] ss:$16 sps:$4 sm:$0xff]  }
  0x60   :  { %281 = vmatprep.subr.bf16.mxu1 %v1187_v14  ;;  %v1276_v48 = vld [vmem:[#allocation8 + $0x144] ss:$16 sps:$4 sm:$0xff]   ;;  %v1274_v49 = vld [vmem:[#allocation8 + $0x140] ss:$16 sps:$4 sm:$0xff]   ;;  %v1237_v9 = vld [vmem:[#allocation8 + $0x2c] ss:$16 sps:$4 sm:$0xff]  }
  0x61   :  { %723 = vmatpush1.bf16.msra.mxu0 %v1214_v29  ;;  %v1536_v53 = vld [vmem:[#allocation11] sm:$0xff]  ;;  %v1235_v10 = vld [vmem:[#allocation8 + $0x28] ss:$16 sps:$4 sm:$0xff]   ;;  %v1243_v11 = vld [vmem:[#allocation8 + $0xc] ss:$16 sps:$4 sm:$0xff]   ;;  %s1013_s5 = sshll.u32 %s1473_s4, 4  ;;  %s1014_s5 = int_to_ptr.vmem [resolvable:$true] %s1013_s5 }
  0x62   :  { %724 = vmatprep.subr.bf16.mxu0 %v1222_v30  ;;  %v114_v54 = vrot.slane %v1536_v53, %v113_v52  ;;  %v1241_v12 = vld [vmem:[#allocation8 + $0x8] ss:$16 sps:$4 sm:$0xff]   ;;  %v1249_v13 = vld [vmem:[#allocation8 + $0x1ec] ss:$16 sps:$4 sm:$0xff]   ;;  %v1282_v25 = vld [vmem:[#allocation8 + $0x124] ss:$16 sps:$4 sm:$0xff]   ;;  %p1433_p3 = scmp.lt.s32.totalorder %s1014_s5, %s1014_s5 }
  0x63   :  { %282 = vmatpush1.bf16.msra.mxu1 %v1189_v15  ;;  %v1247_v14 = vld [vmem:[#allocation8 + $0x1e8] ss:$16 sps:$4 sm:$0xff]   ;;  %v1255_v15 = vld [vmem:[#allocation8 + $0x1cc] ss:$16 sps:$4 sm:$0xff]   ;;  %v1280_v27 = vld [vmem:[#allocation8 + $0x120] ss:$16 sps:$4 sm:$0xff]  }
  0x64   :  { %283 = vmatprep.subr.bf16.mxu1 %v1190_v16  ;;  %v1253_v16 = vld [vmem:[#allocation8 + $0x1c8] ss:$16 sps:$4 sm:$0xff]   ;;  %v1273_v21 = vld [vmem:[#allocation8 + $0x16c] ss:$16 sps:$4 sm:$0xff]   ;;  %v1288_v29 = vld [vmem:[#allocation8 + $0x104] ss:$16 sps:$4 sm:$0xff]  }
  0x65   :  { %725 = vmatpush1.bf16.msra.mxu0 %v1220_v31  ;;  %v1265_v20 = vld [vmem:[#allocation8 + $0x188] ss:$16 sps:$4 sm:$0xff]   ;;  %v1285_v26 = vld [vmem:[#allocation8 + $0x12c] ss:$16 sps:$4 sm:$0xff]   ;;  %v1286_v31 = vld [vmem:[#allocation8 + $0x100] ss:$16 sps:$4 sm:$0xff]  }
  0x66   :  { %726 = vmatprep.subr.bf16.mxu0 %v1228_v32  ;;  %v1271_v22 = vld [vmem:[#allocation8 + $0x168] ss:$16 sps:$4 sm:$0xff]   ;;  %v1291_v30 = vld [vmem:[#allocation8 + $0x10c] ss:$16 sps:$4 sm:$0xff]   ;;  %s1428_s24 = scalar_lea.vmem %s1014_s5, 128 }
  0x67   :  { %284 = vmatpush1.bf16.msra.mxu1 %v1192_v17  ;;  %v1261_v17 = vld [vmem:[#allocation8 + $0x1ac] ss:$16 sps:$4 sm:$0xff]   ;;  %v1277_v24 = vld [vmem:[#allocation8 + $0x148] ss:$16 sps:$4 sm:$0xff]   ;;  %p1429_p2 = scmp.ne.s32.totalorder %s1014_s5, %s1428_s24  ;;  %p1434_p4 = scmp.lt.s32.totalorder %s1428_s24, %s1428_s24 }
  0x68   :  { %285 = vmatprep.subr.bf16.mxu1 %v1193_v18  ;;  %v1259_v18 = vld [vmem:[#allocation8 + $0x1a8] ss:$16 sps:$4 sm:$0xff]  }
  0x69   :  { %727 = vmatpush1.bf16.msra.mxu0 %v1226_v33  ;;  %v1283_v28 = vld [vmem:[#allocation8 + $0x128] ss:$16 sps:$4 sm:$0xff]   ;;  %p1435_p5 = por %p1434_p4, %p1433_p3 }
  0x6a   :  { %728 = vmatprep.subr.bf16.mxu0 %v1234_v34  ;;  %v1289_v32 = vld [vmem:[#allocation8 + $0x108] ss:$16 sps:$4 sm:$0xff]   ;;  %v185_v34 = vsub.s32 1, %v1533_v51 }
  0x6b   :  { %286 = vmatpush1.bf16.msra.mxu1 %v1195_v19  ;;  %v1267_v19 = vld [vmem:[#allocation8 + $0x18c] ss:$16 sps:$4 sm:$0xff]   ;;  %p1436_p6 = pnand %p1435_p5, %p1429_p2 }
  0x6c   :  { %757 = vmatprep.subr.bf16.mxu1 %v1201_v23  ;;  %v1279_v23 = vld [vmem:[#allocation8 + $0x14c] ss:$16 sps:$4 sm:$0xff]  }
  0x6d   :  { %729 = vmatpush1.bf16.msra.mxu0 %v1232_v35  ;;  %v1292_v33 = vld [vmem:[#allocation10 + $0x78] sm:$0xff]   ;;  %v1540_v35 = vld [vmem:[#allocation11 + $0x8] sm:$0xff] }
  0x6e   :  { %730 = vmatprep.subr.bf16.mxu0 %v1240_v36  ;;  %v186_v36 = vrot.slane %v1536_v53, %v185_v34  ;;  %v1296_v52 = vld [vmem:[#allocation10 + $0x68] sm:$0xff]  }
  0x71   :  { %731 = vmatpush1.bf16.msra.mxu0 %v1238_v37  ;;  %v190_v37 = vrot.slane %v1540_v35, %v185_v34 }
  0x72   :  { %732 = vmatprep.subr.bf16.mxu0 %v1246_v38 }
  0x75   :  { %733 = vmatpush2.bf16.msra.mxu0 %v1244_v39 }
  0x76   :  { %734 = vmatprep.subr.bf16.mxu0 %v1252_v40 }
  0x79   :  { %735 = vmatpush2.bf16.msra.mxu0 %v1250_v41 }
  0x7a   :  { %736 = vmatprep.subr.bf16.mxu0 %v1258_v42 }
  0x7d   :  { %737 = vmatpush2.bf16.msra.mxu0 %v1256_v43 }
  0x7e   :  { %738 = vmatprep.subr.bf16.mxu0 %v1264_v44 }
  0x81   :  { %739 = vmatpush2.bf16.msra.mxu0 %v1262_v45 }
  0x82   :  { %740 = vmatprep.subr.bf16.mxu0 %v1270_v46 }
  0x85   :  { %741 = vmatpush2.bf16.msra.mxu0 %v1268_v47  ;;  %v1293_v47 = vld [vmem:[#allocation10 + $0x38] sm:$0xff]  }
  0x86   :  { %742 = vmatprep.subr.bf16.mxu0 %v1276_v48 }
  0x89   :  { %743 = vmatpush2.bf16.msra.mxu0 %v1274_v49  ;;  %v1294_v49 = vld [vmem:[#allocation10 + $0x70] sm:$0xff]  }
  0x8a   :  { %744 = vmatprep.subr.bf16.mxu0 %v1282_v25 }
  0x8d   :  { %745 = vmatpush2.bf16.msra.mxu0 %v1280_v27 }
  0x8e   :  { %746 = vmatprep.subr.bf16.mxu0 %v1288_v29 }
  0x91   :  { %747 = vmatpush2.bf16.msra.mxu0 %v1286_v31 }
  0x92   :  { %1125 = vmatprep.subr.bf16.mxu0 %v1292_v33 }
 0x111   :  { %v159_v55 = vpop.f32.mrf.mxu0 }
 0x112   :  { %v160_v56 = vadd.f32 %v159_v55, %v114_v54  ;;  %v1297_v54 = vld [vmem:[#allocation10 + $0x28] sm:$0xff]   ;;  %v1298_v55 = vld [vmem:[#allocation10 + $0x60] sm:$0xff]  }
 0x113   :  { %v1151_v57 = vpop.f32.mrf.mxu0 }
 0x114   :  { %v165_v58 = vmax.f32 %v160_v56, 0.0  ;;  %v1299_v56 = vld [vmem:[#allocation10 + $0x20] sm:$0xff]   ;;  %v1300_v57 = vld [vmem:[#allocation10 + $0x58] sm:$0xff]  }
 0x115   :  { %v162_v59 = vpop.f32.mrf.mxu0 }
 0x116   :  { %v166_v61 = vpack.c.bf16 %v165_v58, %v165_v58  ;;  %v1301_v58 = vld [vmem:[#allocation10 + $0x18] sm:$0xff]   ;;  %v1302_v59 = vld [vmem:[#allocation10 + $0x50] sm:$0xff]  }
 0x117   :  { %v1152_v63 = vpop.f32.mrf.mxu0 }
 0x118   :  { %304 = vmatmul.mubr.bf16.vlgmr.msra.gmra.mxu1 %v166_v61  ;;  %v1304_v61 = vld [vmem:[#allocation10 + $0x48] sm:$0xff]   ;;  %v1306_v63 = vld [vmem:[#allocation10 + $0x40] sm:$0xff]  }
 0x119   :  { %758 = vmatpush1.bf16.msra.mxu1 %v1199_v60  ;;  %v1303_v60 = vld [vmem:[#allocation10 + $0x10] sm:$0xff]  }
 0x11a   :  { %759 = vmatprep.subr.bf16.mxu1 %v1207_v62  ;;  %v1305_v62 = vld [vmem:[#allocation10 + $0x8] sm:$0xff]  }
 0x11d   :  { %760 = vmatpush1.bf16.msra.mxu1 %v1205_v0  ;;  %v1307_v0 = vld [vmem:[#allocation10] sm:$0xff]  }
 0x11e   :  { %761 = vmatprep.subr.bf16.mxu1 %v1213_v1  ;;  %v382_v1 = vsub.s32 2, %v1533_v51 }
 0x121   :  { %762 = vmatpush1.bf16.msra.mxu1 %v1211_v2  ;;  %v105_v2 = vld [vmem:[#allocation11 + $0x10] sm:$0xff] }
 0x122   :  { %763 = vmatprep.subr.bf16.mxu1 %v1219_v3  ;;  %v106_v3 = vld [vmem:[#allocation11 + $0x18] sm:$0xff] }
 0x125   :  { %764 = vmatpush1.bf16.msra.mxu1 %v1217_v4  ;;  %v383_v4 = vrot.slane %v1536_v53, %v382_v1 }
 0x126   :  { %765 = vmatprep.subr.bf16.mxu1 %v1225_v5  ;;  %v391_v5 = vrot.slane %v105_v2, %v382_v1 }
 0x129   :  { %766 = vmatpush1.bf16.msra.mxu1 %v1223_v6  ;;  %v979_v6 = vsub.s32 4, %v1533_v51 }
 0x12a   :  { %767 = vmatprep.subr.bf16.mxu1 %v1231_v7  ;;  %v387_v7 = vrot.slane %v1540_v35, %v382_v1 }
 0x12d   :  { %768 = vmatpush1.bf16.msra.mxu1 %v1229_v8  ;;  %v395_v8 = vrot.slane %v106_v3, %v382_v1 }
 0x12e   :  { %769 = vmatprep.subr.bf16.mxu1 %v1237_v9 }
 0x131   :  { %770 = vmatpush1.bf16.msra.mxu1 %v1235_v10 }
 0x132   :  { %771 = vmatprep.subr.bf16.mxu1 %v1243_v11 }
 0x135   :  { %772 = vmatpush1.bf16.msra.mxu1 %v1241_v12 }
 0x136   :  { %773 = vmatprep.subr.bf16.mxu1 %v1249_v13 }
 0x139   :  { %774 = vmatpush2.bf16.msra.mxu1 %v1247_v14 }
 0x13a   :  { %775 = vmatprep.subr.bf16.mxu1 %v1255_v15  ;;  %v980_v15 = vrot.slane %v1536_v53, %v979_v6 }
 0x13d   :  { %776 = vmatpush2.bf16.msra.mxu1 %v1253_v16 }
 0x13e   :  { %777 = vmatprep.subr.bf16.mxu1 %v1261_v17 }
 0x141   :  { %778 = vmatpush2.bf16.msra.mxu1 %v1259_v18 }
 0x142   :  { %779 = vmatprep.subr.bf16.mxu1 %v1267_v19  ;;  %v984_v19 = vrot.slane %v1540_v35, %v979_v6 }
 0x145   :  { %780 = vmatpush2.bf16.msra.mxu1 %v1265_v20 }
 0x146   :  { %781 = vmatprep.subr.bf16.mxu1 %v1273_v21 }
 0x149   :  { %782 = vmatpush2.bf16.msra.mxu1 %v1271_v22 }
 0x14a   :  { %783 = vmatprep.subr.bf16.mxu1 %v1279_v23 }
 0x14d   :  { %784 = vmatpush2.bf16.msra.mxu1 %v1277_v24 }
 0x14e   :  { %785 = vmatprep.subr.bf16.mxu1 %v1285_v26 }
 0x151   :  { %786 = vmatpush2.bf16.msra.mxu1 %v1283_v28 }
 0x152   :  { %787 = vmatprep.subr.bf16.mxu1 %v1291_v30 }
 0x155   :  { %788 = vmatpush2.bf16.msra.mxu1 %v1289_v32  ;;  %v838_v32 = vsub.s32 3, %v1533_v51 }
 0x157   :  { %v839_v34 = vrot.slane %v1536_v53, %v838_v32 }
 0x1d8   :  { %v305_v38 = vpop.f32.mrf.mxu1 }
 0x1d9   :  { %v306_v39 = vadd.f32 %v305_v38, %v186_v36 }
 0x1da   :  { %v307_v40 = vpop.f32.mrf.mxu1 }
 0x1db   :  { %v308_v41 = vadd.f32 %v307_v40, %v190_v37  ;;  %v312_v42 = vmax.f32 %v306_v39, 0.0 }
 0x1dc   :  { %v309_v43 = vpop.f32.mrf.mxu1 }
 0x1dd   :  { %v313_v44 = vmax.f32 %v308_v41, 0.0  ;;  %v314_v48 = vpack.c.bf16 %v312_v42, %v312_v42  ;;  %v992_v41 = vsub.s32 5, %v1533_v51 }
 0x1de   :  { %v310_v45 = vpop.f32.mrf.mxu1 }
 0x1df   :  { %v315_v46 = vpack.c.bf16 %v313_v44, %v313_v44  ;;  %v993_v42 = vrot.slane %v1536_v53, %v992_v41 }
 0x1e1   :  { %748 = vmatprep.mubr.bf16.mxu0 %v315_v46  ;;  %789 = vmatprep.mubr.bf16.mxu1 %v315_v46 }
 0x1e2   :  { %749 = vmatmul.mubr.bf16.vlgmr.msra.gmra.mxu0 %v314_v48  ;;  %790 = vmatmul.mubr.bf16.vlgmr.msra.gmra.mxu1 %v314_v48 }
 0x1e3   :  { %1126 = vmatpush3.bf16.msra.mxu0 %v1293_v47 }
 0x1e4   :  { %1127 = vmatprep.subr.bf16.mxu0 %v1294_v49 }
 0x1e7   :  { %1128 = vmatpush3.bf16.msra.mxu0 %v1295_v50 }
 0x1e8   :  { %1129 = vmatprep.subr.bf16.mxu0 %v1296_v52 }
 0x1eb   :  { %1130 = vmatpush3.bf16.msra.mxu0 %v1297_v54 }
 0x1ec   :  { %1131 = vmatprep.subr.bf16.mxu0 %v1298_v55 }
 0x1ef   :  { %1132 = vmatpush3.bf16.msra.mxu0 %v1299_v56 }
 0x1f0   :  { %1133 = vmatprep.subr.bf16.mxu0 %v1300_v57 }
 0x1f3   :  { %1134 = vmatpush3.bf16.msra.mxu0 %v1301_v58 }
 0x1f4   :  { %1135 = vmatprep.subr.bf16.mxu0 %v1302_v59 }
 0x1f7   :  { %1136 = vmatpush3.bf16.msra.mxu0 %v1303_v60 }
 0x1f8   :  { %1137 = vmatprep.subr.bf16.mxu0 %v1304_v61 }
 0x1fb   :  { %1138 = vmatpush3.bf16.msra.mxu0 %v1305_v62 }
 0x1fc   :  { %1139 = vmatprep.subr.bf16.mxu0 %v1306_v63 }
 0x1ff   :  { %1140 = vmatpush3.bf16.msra.mxu0 %v1307_v0 }
 0x2a2   :  { %v750_v9 = vpop.f32.mrf.mxu0  ;;  %v791_v10 = vpop.f32.mrf.mxu1 }
 0x2a3   :  { %v751_v11 = vadd.f32 %v750_v9, %v383_v4  ;;  %v792_v12 = vadd.f32 %v791_v10, %v391_v5 }
 0x2a4   :  { %v752_v13 = vpop.f32.mrf.mxu0  ;;  %v793_v14 = vpop.f32.mrf.mxu1 }
 0x2a5   :  { %v798_v16 = vmax.f32 %v751_v11, 0.0  ;;  %v753_v17 = vadd.f32 %v752_v13, %v387_v7  ;;  %v794_v18 = vadd.f32 %v793_v14, %v395_v8  ;;  %v800_v20 = vmax.f32 %v792_v12, 0.0 }
 0x2a6   :  { %v754_v21 = vpop.f32.mrf.mxu0  ;;  %v795_v22 = vpop.f32.mrf.mxu1 }
 0x2a7   :  { %v799_v23 = vmax.f32 %v753_v17, 0.0  ;;  %v801_v24 = vmax.f32 %v794_v18, 0.0  ;;  %v985_v28 = vmul.f32 %v980_v15, %v798_v16  ;;  %v802_v30 = vpack.c.bf16 %v800_v20, %v800_v20 }
 0x2a8   :  { %v755_v25 = vpop.f32.mrf.mxu0  ;;  %v796_v26 = vpop.f32.mrf.mxu1 }
 0x2a9   :  { %v803_v27 = vpack.c.bf16 %v801_v24, %v801_v24  ;;  %v986_v29 = vmul.f32 %v984_v19, %v799_v23 }
 0x2ab   :  { %968 = vmatprep.mubr.bf16.mxu0 %v803_v27  ;;  %v987_v31 = vadd.f32 %v986_v29, %v985_v28 }
 0x2ac   :  { %969 = vmatmul.mubr.bf16.vlgmr.msra.gmra.mxu0 %v802_v30 }
 0x2ad   :  { %988 = vadd.xlane.f32.xlu0 %v987_v31 }
 0x336   :  { %v989_v43 = vpop.xlane.xlu0 %988 }
 0x337   :  { %v994_v44 = vadd.f32 %v993_v42, %v989_v43 }
 0x339   :  { %v995_v46 = vmax.f32 %v994_v44, 0.0 }
 0x36c   :  { %v1141_v33 = vpop.f32.mrf.mxu0 }
 0x36e   :  { %v1142_v35 = vpop.f32.mrf.mxu0 }
 0x36f   :  { %v1143_v36 = vadd.f32 %v1142_v35, %v1141_v33 }
 0x370   :  { %v1144_v37 = vpop.f32.mrf.mxu0 }
 0x371   :  { %v971_v38 = vadd.f32 %v1143_v36, %v839_v34 }
 0x372   :  { %v1145_v39 = vpop.f32.mrf.mxu0 }
 0x373   :  { %v976_v40 = vmax.f32 %v971_v38, 0.0 }
 0x375   :  { %996 = vadd.xlane.f32.xlu0 %v976_v40 }
 0x3fe   :  { %v997_v45 = vpop.xlane.xlu0 %996 }
 0x3ff   :  { %v998_v47 = vmul.f32 0.125, %v997_v45 }
 0x401   :  { %v999_v48 = vsub.f32 %v995_v46, %v998_v47 }
 0x403   :  { %1002 = vperm.xlu1 %1169, %v999_v48  }
 0x47e   :  { %v1003_v49 = vpop.permute.xlu1 %1002 }
 0x47f   :  { %v1005_v50 = vadd.f32 %v1003_v49, %v976_v40 }
 0x481   :  { %1006 = vst [vmem:[#allocation13] sm:$0xff] %v1005_v50 }
 0x482   :  { %1439 = shalt.err (!%p1436_p6)
}
 0x483   :  { %1016 = dma.vmem_to_hbm [thread:$0]  %s1014_s5, 128, %s1563_s6, [#allocation4]  }
 0x484   :  { %1456 = dma.done.wait [#allocation4], 128  }
 0x485   :  { %1457 = vsyncadd [#allocation4], 4294967168 }
 0x486   :  { %1020 = vsyncpa [#allocation3], 1 }
 0x487   :  { %1021 = vsyncpa [#allocation6], 1 }
 0x488   :  { %1022 = vsyncpa [#allocation9], 1 }
 0x489   :  { %1023 = vsyncpa [#allocation12], 1 }
 0x48a   :  { %1024 = vsyncpa [#allocation4], 1 }

</bundles_post_ra>
